<compile_context>
chip_gen: v6e
topology: v6e:2x2x1
jax: 0.10.0
libtpu: 0.0.40
codegen_flags: <defaults>
</compile_context>

<pallas_src>
import functools

import jax
import jax.numpy as jnp
from jax.experimental import pallas as pl
from jax.experimental.pallas import tpu as pltpu  # noqa: F401  (TPU backend)

D_MODEL = 32
N_HEADS = 4
D_FF = 64
SEQ = 8
BATCH = 2
LN_EPS = 1e-5  # PyTorch nn.LayerNorm default eps


def _layer_norm(x, gamma, beta):
    # PyTorch LayerNorm: population (biased) variance over the last dim.
    mean = jnp.mean(x, axis=-1, keepdims=True)
    var = jnp.mean((x - mean) ** 2, axis=-1, keepdims=True)
    # lax.rsqrt lowers to the EUP (free slot alongside VALU work).
    return (x - mean) * jax.lax.rsqrt(var + LN_EPS) * gamma + beta


def encoder_layer_kernel(
    x_ref,       # (B*S, D)
    wqkv_ref,    # (D, 3*D)   fused Q|K|V projection weight
    bqkv_ref,    # (1, 3*D)   fused Q|K|V bias
    wo_ref,      # (D, D)
    w1_ref,      # (D, D_FF)
    b1_ref,      # (1, D_FF)
    w2_ref,      # (D_FF, D)
    vecs_ref,    # (6, D): rows = [bo, gamma1, beta1, b2, gamma2, beta2]
    out_ref,     # (B*S, D)
    *, n_heads, batch, seq,
):
    x = x_ref[...].astype(jnp.float32)          # (B*S, D)
    _, d = x.shape
    dk = d // n_heads
    scale = dk ** -0.5                          # static Python float

    # Keep all broadcast vectors as (1, D) rows (2D layout).
    bo = vecs_ref[0:1, :]
    g1 = vecs_ref[1:2, :]
    be1 = vecs_ref[2:3, :]
    b2 = vecs_ref[3:4, :]
    g2 = vecs_ref[4:5, :]
    be2 = vecs_ref[5:6, :]

    # ---- Multi-head self-attention (q = k = v = x) ----
    # Fused QKV projection: one (B*S, D) x (D, 3D) MXU matmul.
    qkv = jnp.dot(x, wqkv_ref[...], preferred_element_type=jnp.float32) + bqkv_ref[...]

    # Re-pack per-head lane slices into a single (H*B, S, dk) batch so the
    # score / context matmuls and the softmax run once over all heads.
    def split_heads(base):
        return jnp.concatenate(
            [qkv[:, base + h * dk: base + (h + 1) * dk].reshape(batch, seq, dk)
             for h in range(n_heads)],
            axis=0)

    qh = split_heads(0) * scale  # (H*B, S, dk)  (scale folded into q)
    kh = split_heads(d)
    vh = split_heads(2 * d)

    scores = jnp.einsum("bqd,bkd->bqk", qh, kh,
                        preferred_element_type=jnp.float32)             # (H*B, S, S)
    # TODO(synk): src_mask support omitted (forward is exercised with src_mask=None)
    scores = scores - jnp.max(scores, axis=-1, keepdims=True)
    p = jnp.exp(scores)
    p = p * pl.reciprocal(jnp.sum(p, axis=-1, keepdims=True), approx=True)
    ctx = jnp.einsum("bqk,bkd->bqd", p, vh,
                     preferred_element_type=jnp.float32)                # (H*B, S, dk)

    # Merge heads back to (B*S, D) with the standard concat-by-head lane order.
    attn = jnp.concatenate(
        [ctx[h * batch:(h + 1) * batch].reshape(batch * seq, dk)
         for h in range(n_heads)],
        axis=-1)                                                         # (B*S, D)

    mha_out = jnp.dot(attn, wo_ref[...], preferred_element_type=jnp.float32) + bo

    # dropout_layer_1 == identity (eval mode)
    x1 = _layer_norm(mha_out + x, g1, be1)

    # ---- Position-wise feed-forward: Linear -> ReLU -> Linear ----
    hid = jnp.dot(x1, w1_ref[...], preferred_element_type=jnp.float32) + b1_ref[...]
    hid = jnp.maximum(hid, 0.0)
    ffn = jnp.dot(hid, w2_ref[...], preferred_element_type=jnp.float32) + b2

    # dropout_layer_2 == identity (eval mode)
    x2 = _layer_norm(ffn + x1, g2, be2)

    out_ref[...] = x2.astype(out_ref.dtype)


@functools.partial(jax.jit, static_argnames=("n_heads",))
def encoder_layer(x, params, n_heads=N_HEADS):
    B, S, D = x.shape
    assert D % n_heads == 0
    # Weight layout contract: (in_features, out_features) == PyTorch weight.T
    assert params["wq"].shape == (D, D) and params["wo"].shape == (D, D)
    assert params["w1"].shape[0] == D and params["w2"].shape[1] == D

    # Host/XLA-side packing (cheap, done once per call):
    wqkv = jnp.concatenate([params["wq"], params["wk"], params["wv"]], axis=1)   # (D, 3D)
    bqkv = jnp.concatenate([params["bq"], params["bk"], params["bv"]])[None, :]  # (1, 3D)
    vecs = jnp.stack([params["bo"], params["g1"], params["be1"],
                      params["b2"], params["g2"], params["be2"]], axis=0)        # (6, D)
    b1 = params["b1"][None, :]                                                   # (1, D_FF)

    x2 = x.reshape(B * S, D)   # fold batch*seq into the matmul M dimension

    out = pl.pallas_call(
        functools.partial(encoder_layer_kernel, n_heads=n_heads, batch=B, seq=S),
        out_shape=jax.ShapeDtypeStruct((B * S, D), x.dtype),
        # No grid / BlockSpecs: whole-array VMEM blocks, a single kernel step.
        # The entire working set is < 100 KB, so one step removes all per-step
        # pipelining overhead and stages every parameter exactly once.
    )(x2, wqkv, bqkv, params["wo"], params["w1"], b1, params["w2"], vecs)
    return out.reshape(B, S, D)


def init_params(key, d_model=D_MODEL, d_ff=D_FF):
    ks = jax.random.split(key, 12)

    def lin(k, fan_in, fan_out):
        w = 0.05 * jax.random.normal(k, (fan_in, fan_out), dtype=jnp.float32)
        b = 0.01 * jax.random.normal(jax.random.fold_in(k, 1), (fan_out,), dtype=jnp.float32)
        return w, b

    wq, bq = lin(ks[0], d_model, d_model)
    wk, bk = lin(ks[1], d_model, d_model)
    wv, bv = lin(ks[2], d_model, d_model)
    wo, bo = lin(ks[3], d_model, d_model)
    w1, b1 = lin(ks[4], d_model, d_ff)
    w2, b2 = lin(ks[5], d_ff, d_model)
    return dict(
        wq=wq, bq=bq, wk=wk, bk=bk, wv=wv, bv=bv, wo=wo, bo=bo,
        g1=jnp.ones((d_model,), jnp.float32), be1=jnp.zeros((d_model,), jnp.float32),
        w1=w1, b1=b1, w2=w2, b2=b2,
        g2=jnp.ones((d_model,), jnp.float32), be2=jnp.zeros((d_model,), jnp.float32),
    )


if __name__ == "__main__":
    key = jax.random.PRNGKey(0)
    pkey, xkey = jax.random.split(key)
    params = init_params(pkey)
    x = jax.random.normal(xkey, (BATCH, SEQ, D_MODEL), dtype=jnp.float32)

    out = encoder_layer(x, params)
    out = jax.block_until_ready(out)
    assert out.shape == (BATCH, SEQ, D_MODEL)
    assert bool(jnp.all(jnp.isfinite(out)))
    print("KERNEL_OK")
</pallas_src>

<mosaic_0001>
module attributes {stable_mosaic.version = 11 : i64} {
  func.func @encoder_layer_kernel(%arg0: memref<16x32xf32, #tpu.memory_space<vmem>>, %arg1: memref<32x96xf32, #tpu.memory_space<vmem>>, %arg2: memref<1x96xf32, #tpu.memory_space<vmem>>, %arg3: memref<32x32xf32, #tpu.memory_space<vmem>>, %arg4: memref<32x64xf32, #tpu.memory_space<vmem>>, %arg5: memref<1x64xf32, #tpu.memory_space<vmem>>, %arg6: memref<64x32xf32, #tpu.memory_space<vmem>>, %arg7: memref<6x32xf32, #tpu.memory_space<vmem>>, %arg8: memref<16x32xf32, #tpu.memory_space<vmem>>) attributes {dimension_semantics = [], scalar_prefetch = 0 : i64, scratch_operands = 0 : i64, tpu.core_type = #tpu.core_type<tc>} {
    %c0 = arith.constant 0 : index
    %c0_0 = arith.constant 0 : index
    %0 = vector.load %arg0[%c0, %c0_0] : memref<16x32xf32, #tpu.memory_space<vmem>>, vector<16x32xf32>
    %c0_1 = arith.constant 0 : index
    %c0_2 = arith.constant 0 : index
    %1 = vector.load %arg7[%c0_1, %c0_2] : memref<6x32xf32, #tpu.memory_space<vmem>>, vector<1x32xf32>
    %c1 = arith.constant 1 : index
    %c0_3 = arith.constant 0 : index
    %2 = vector.load %arg7[%c1, %c0_3] : memref<6x32xf32, #tpu.memory_space<vmem>>, vector<1x32xf32>
    %c2 = arith.constant 2 : index
    %c0_4 = arith.constant 0 : index
    %3 = vector.load %arg7[%c2, %c0_4] : memref<6x32xf32, #tpu.memory_space<vmem>>, vector<1x32xf32>
    %c3 = arith.constant 3 : index
    %c0_5 = arith.constant 0 : index
    %4 = vector.load %arg7[%c3, %c0_5] : memref<6x32xf32, #tpu.memory_space<vmem>>, vector<1x32xf32>
    %c4 = arith.constant 4 : index
    %c0_6 = arith.constant 0 : index
    %5 = vector.load %arg7[%c4, %c0_6] : memref<6x32xf32, #tpu.memory_space<vmem>>, vector<1x32xf32>
    %c5 = arith.constant 5 : index
    %c0_7 = arith.constant 0 : index
    %6 = vector.load %arg7[%c5, %c0_7] : memref<6x32xf32, #tpu.memory_space<vmem>>, vector<1x32xf32>
    %c0_8 = arith.constant 0 : index
    %c0_9 = arith.constant 0 : index
    %7 = vector.load %arg1[%c0_8, %c0_9] : memref<32x96xf32, #tpu.memory_space<vmem>>, vector<32x96xf32>
    %cst = arith.constant dense<0.000000e+00> : vector<16x96xf32>
    %8 = tpu.matmul %0, %7, %cst {dimension_numbers = #tpu.dot_dimension_numbers<[1], [0], [0], [1], [0, 0, 1, 1], [], []>} : vector<16x32xf32>, vector<32x96xf32>, vector<16x96xf32> -> vector<16x96xf32>
    %c0_10 = arith.constant 0 : index
    %c0_11 = arith.constant 0 : index
    %9 = vector.load %arg2[%c0_10, %c0_11] : memref<1x96xf32, #tpu.memory_space<vmem>>, vector<1x96xf32>
    %10 = vector.broadcast %9 : vector<1x96xf32> to vector<16x96xf32>
    %11 = arith.addf %8, %10 : vector<16x96xf32>
    %12 = vector.extract_strided_slice %11 {offsets = [0, 0], sizes = [16, 8], strides = [1, 1]} : vector<16x96xf32> to vector<16x8xf32>
    %13 = vector.shape_cast %12 : vector<16x8xf32> to vector<2x8x8xf32>
    %14 = vector.extract_strided_slice %11 {offsets = [0, 8], sizes = [16, 8], strides = [1, 1]} : vector<16x96xf32> to vector<16x8xf32>
    %15 = vector.shape_cast %14 : vector<16x8xf32> to vector<2x8x8xf32>
    %16 = vector.extract_strided_slice %11 {offsets = [0, 16], sizes = [16, 8], strides = [1, 1]} : vector<16x96xf32> to vector<16x8xf32>
    %17 = vector.shape_cast %16 : vector<16x8xf32> to vector<2x8x8xf32>
    %18 = vector.extract_strided_slice %11 {offsets = [0, 24], sizes = [16, 8], strides = [1, 1]} : vector<16x96xf32> to vector<16x8xf32>
    %19 = vector.shape_cast %18 : vector<16x8xf32> to vector<2x8x8xf32>
    %20 = tpu.concatenate %13, %15, %17, %19 in 0 : vector<2x8x8xf32>, vector<2x8x8xf32>, vector<2x8x8xf32>, vector<2x8x8xf32> -> vector<8x8x8xf32>
    %cst_12 = arith.constant 0.353553385 : f32
    %21 = vector.broadcast %cst_12 : f32 to vector<8x8x8xf32>
    %22 = arith.mulf %20, %21 : vector<8x8x8xf32>
    %23 = vector.extract_strided_slice %11 {offsets = [0, 32], sizes = [16, 8], strides = [1, 1]} : vector<16x96xf32> to vector<16x8xf32>
    %24 = vector.shape_cast %23 : vector<16x8xf32> to vector<2x8x8xf32>
    %25 = vector.extract_strided_slice %11 {offsets = [0, 40], sizes = [16, 8], strides = [1, 1]} : vector<16x96xf32> to vector<16x8xf32>
    %26 = vector.shape_cast %25 : vector<16x8xf32> to vector<2x8x8xf32>
    %27 = vector.extract_strided_slice %11 {offsets = [0, 48], sizes = [16, 8], strides = [1, 1]} : vector<16x96xf32> to vector<16x8xf32>
    %28 = vector.shape_cast %27 : vector<16x8xf32> to vector<2x8x8xf32>
    %29 = vector.extract_strided_slice %11 {offsets = [0, 56], sizes = [16, 8], strides = [1, 1]} : vector<16x96xf32> to vector<16x8xf32>
    %30 = vector.shape_cast %29 : vector<16x8xf32> to vector<2x8x8xf32>
    %31 = tpu.concatenate %24, %26, %28, %30 in 0 : vector<2x8x8xf32>, vector<2x8x8xf32>, vector<2x8x8xf32>, vector<2x8x8xf32> -> vector<8x8x8xf32>
    %32 = vector.extract_strided_slice %11 {offsets = [0, 64], sizes = [16, 8], strides = [1, 1]} : vector<16x96xf32> to vector<16x8xf32>
    %33 = vector.shape_cast %32 : vector<16x8xf32> to vector<2x8x8xf32>
    %34 = vector.extract_strided_slice %11 {offsets = [0, 72], sizes = [16, 8], strides = [1, 1]} : vector<16x96xf32> to vector<16x8xf32>
    %35 = vector.shape_cast %34 : vector<16x8xf32> to vector<2x8x8xf32>
    %36 = vector.extract_strided_slice %11 {offsets = [0, 80], sizes = [16, 8], strides = [1, 1]} : vector<16x96xf32> to vector<16x8xf32>
    %37 = vector.shape_cast %36 : vector<16x8xf32> to vector<2x8x8xf32>
    %38 = vector.extract_strided_slice %11 {offsets = [0, 88], sizes = [16, 8], strides = [1, 1]} : vector<16x96xf32> to vector<16x8xf32>
    %39 = vector.shape_cast %38 : vector<16x8xf32> to vector<2x8x8xf32>
    %40 = tpu.concatenate %33, %35, %37, %39 in 0 : vector<2x8x8xf32>, vector<2x8x8xf32>, vector<2x8x8xf32>, vector<2x8x8xf32> -> vector<8x8x8xf32>
    "tpu.trace_start"() <{level = 10 : i32, message = "bqd,bkd->bqk"}> : () -> ()
    %cst_13 = arith.constant dense<0.000000e+00> : vector<8x8x8xf32>
    %41 = tpu.matmul %22, %31, %cst_13 {dimension_numbers = #tpu.dot_dimension_numbers<[2], [2], [1], [1], [0, 0, 0, 1, 1, 1], [0], [0]>} : vector<8x8x8xf32>, vector<8x8x8xf32>, vector<8x8x8xf32> -> vector<8x8x8xf32>
    "tpu.trace_stop"() : () -> ()
    %cst_14 = arith.constant dense<0xFF800000> : vector<8x8xf32>
    %42 = vector.multi_reduction <maximumf>, %41, %cst_14 [2] : vector<8x8x8xf32> to vector<8x8xf32>
    %43 = vector.shape_cast %42 : vector<8x8xf32> to vector<8x8x1xf32>
    %44 = vector.broadcast %43 : vector<8x8x1xf32> to vector<8x8x8xf32>
    %45 = arith.subf %41, %44 : vector<8x8x8xf32>
    %46 = math.exp %45 : vector<8x8x8xf32>
    %cst_15 = arith.constant dense<0.000000e+00> : vector<8x8xf32>
    %47 = vector.multi_reduction <add>, %46, %cst_15 [2] : vector<8x8x8xf32> to vector<8x8xf32>
    %48 = vector.shape_cast %47 : vector<8x8xf32> to vector<8x8x1xf32>
    %49 = tpu.reciprocal %48 {approx = true} : vector<8x8x1xf32> -> vector<8x8x1xf32>
    %50 = vector.broadcast %49 : vector<8x8x1xf32> to vector<8x8x8xf32>
    %51 = arith.mulf %46, %50 : vector<8x8x8xf32>
    "tpu.trace_start"() <{level = 10 : i32, message = "bqk,bkd->bqd"}> : () -> ()
    %cst_16 = arith.constant dense<0.000000e+00> : vector<8x8x8xf32>
    %52 = tpu.matmul %51, %40, %cst_16 {dimension_numbers = #tpu.dot_dimension_numbers<[2], [1], [1], [2], [0, 0, 0, 1, 1, 2], [0], [0]>} : vector<8x8x8xf32>, vector<8x8x8xf32>, vector<8x8x8xf32> -> vector<8x8x8xf32>
    "tpu.trace_stop"() : () -> ()
    %53 = vector.extract_strided_slice %52 {offsets = [0, 0, 0], sizes = [2, 8, 8], strides = [1, 1, 1]} : vector<8x8x8xf32> to vector<2x8x8xf32>
    %54 = vector.shape_cast %53 : vector<2x8x8xf32> to vector<16x8xf32>
    %55 = vector.extract_strided_slice %52 {offsets = [2, 0, 0], sizes = [2, 8, 8], strides = [1, 1, 1]} : vector<8x8x8xf32> to vector<2x8x8xf32>
    %56 = vector.shape_cast %55 : vector<2x8x8xf32> to vector<16x8xf32>
    %57 = vector.extract_strided_slice %52 {offsets = [4, 0, 0], sizes = [2, 8, 8], strides = [1, 1, 1]} : vector<8x8x8xf32> to vector<2x8x8xf32>
    %58 = vector.shape_cast %57 : vector<2x8x8xf32> to vector<16x8xf32>
    %59 = vector.extract_strided_slice %52 {offsets = [6, 0, 0], sizes = [2, 8, 8], strides = [1, 1, 1]} : vector<8x8x8xf32> to vector<2x8x8xf32>
    %60 = vector.shape_cast %59 : vector<2x8x8xf32> to vector<16x8xf32>
    %61 = tpu.concatenate %54, %56, %58, %60 in 1 : vector<16x8xf32>, vector<16x8xf32>, vector<16x8xf32>, vector<16x8xf32> -> vector<16x32xf32>
    %c0_17 = arith.constant 0 : index
    %c0_18 = arith.constant 0 : index
    %62 = vector.load %arg3[%c0_17, %c0_18] : memref<32x32xf32, #tpu.memory_space<vmem>>, vector<32x32xf32>
    %cst_19 = arith.constant dense<0.000000e+00> : vector<16x32xf32>
    %63 = tpu.matmul %61, %62, %cst_19 {dimension_numbers = #tpu.dot_dimension_numbers<[1], [0], [0], [1], [0, 0, 1, 1], [], []>} : vector<16x32xf32>, vector<32x32xf32>, vector<16x32xf32> -> vector<16x32xf32>
    %64 = vector.broadcast %1 : vector<1x32xf32> to vector<16x32xf32>
    %65 = arith.addf %63, %64 : vector<16x32xf32>
    %66 = arith.addf %65, %0 : vector<16x32xf32>
    %cst_20 = arith.constant dense<0.000000e+00> : vector<16xf32>
    %67 = vector.multi_reduction <add>, %66, %cst_20 [1] : vector<16x32xf32> to vector<16xf32>
    %68 = vector.shape_cast %67 : vector<16xf32> to vector<16x1xf32>
    %cst_21 = arith.constant 3.200000e+01 : f32
    %69 = vector.broadcast %cst_21 : f32 to vector<16x1xf32>
    %70 = arith.divf %68, %69 : vector<16x1xf32>
    %71 = vector.broadcast %70 : vector<16x1xf32> to vector<16x32xf32>
    %72 = arith.subf %66, %71 : vector<16x32xf32>
    %73 = arith.mulf %72, %72 : vector<16x32xf32>
    %cst_22 = arith.constant dense<0.000000e+00> : vector<16xf32>
    %74 = vector.multi_reduction <add>, %73, %cst_22 [1] : vector<16x32xf32> to vector<16xf32>
    %75 = vector.shape_cast %74 : vector<16xf32> to vector<16x1xf32>
    %cst_23 = arith.constant 3.200000e+01 : f32
    %76 = vector.broadcast %cst_23 : f32 to vector<16x1xf32>
    %77 = arith.divf %75, %76 : vector<16x1xf32>
    %78 = vector.broadcast %70 : vector<16x1xf32> to vector<16x32xf32>
    %79 = arith.subf %66, %78 : vector<16x32xf32>
    %cst_24 = arith.constant 9.99999974E-6 : f32
    %80 = vector.broadcast %cst_24 : f32 to vector<16x1xf32>
    %81 = arith.addf %77, %80 : vector<16x1xf32>
    %82 = math.rsqrt %81 : vector<16x1xf32>
    %83 = vector.broadcast %82 : vector<16x1xf32> to vector<16x32xf32>
    %84 = arith.mulf %79, %83 : vector<16x32xf32>
    %85 = vector.broadcast %2 : vector<1x32xf32> to vector<16x32xf32>
    %86 = arith.mulf %84, %85 : vector<16x32xf32>
    %87 = vector.broadcast %3 : vector<1x32xf32> to vector<16x32xf32>
    %88 = arith.addf %86, %87 : vector<16x32xf32>
    %c0_25 = arith.constant 0 : index
    %c0_26 = arith.constant 0 : index
    %89 = vector.load %arg4[%c0_25, %c0_26] : memref<32x64xf32, #tpu.memory_space<vmem>>, vector<32x64xf32>
    %cst_27 = arith.constant dense<0.000000e+00> : vector<16x64xf32>
    %90 = tpu.matmul %88, %89, %cst_27 {dimension_numbers = #tpu.dot_dimension_numbers<[1], [0], [0], [1], [0, 0, 1, 1], [], []>} : vector<16x32xf32>, vector<32x64xf32>, vector<16x64xf32> -> vector<16x64xf32>
    %c0_28 = arith.constant 0 : index
    %c0_29 = arith.constant 0 : index
    %91 = vector.load %arg5[%c0_28, %c0_29] : memref<1x64xf32, #tpu.memory_space<vmem>>, vector<1x64xf32>
    %92 = vector.broadcast %91 : vector<1x64xf32> to vector<16x64xf32>
    %93 = arith.addf %90, %92 : vector<16x64xf32>
    %cst_30 = arith.constant 0.000000e+00 : f32
    %94 = vector.broadcast %cst_30 : f32 to vector<16x64xf32>
    %95 = arith.maximumf %93, %94 : vector<16x64xf32>
    %c0_31 = arith.constant 0 : index
    %c0_32 = arith.constant 0 : index
    %96 = vector.load %arg6[%c0_31, %c0_32] : memref<64x32xf32, #tpu.memory_space<vmem>>, vector<64x32xf32>
    %cst_33 = arith.constant dense<0.000000e+00> : vector<16x32xf32>
    %97 = tpu.matmul %95, %96, %cst_33 {dimension_numbers = #tpu.dot_dimension_numbers<[1], [0], [0], [1], [0, 0, 1, 1], [], []>} : vector<16x64xf32>, vector<64x32xf32>, vector<16x32xf32> -> vector<16x32xf32>
    %98 = vector.broadcast %4 : vector<1x32xf32> to vector<16x32xf32>
    %99 = arith.addf %97, %98 : vector<16x32xf32>
    %100 = arith.addf %99, %88 : vector<16x32xf32>
    %cst_34 = arith.constant dense<0.000000e+00> : vector<16xf32>
    %101 = vector.multi_reduction <add>, %100, %cst_34 [1] : vector<16x32xf32> to vector<16xf32>
    %102 = vector.shape_cast %101 : vector<16xf32> to vector<16x1xf32>
    %cst_35 = arith.constant 3.200000e+01 : f32
    %103 = vector.broadcast %cst_35 : f32 to vector<16x1xf32>
    %104 = arith.divf %102, %103 : vector<16x1xf32>
    %105 = vector.broadcast %104 : vector<16x1xf32> to vector<16x32xf32>
    %106 = arith.subf %100, %105 : vector<16x32xf32>
    %107 = arith.mulf %106, %106 : vector<16x32xf32>
    %cst_36 = arith.constant dense<0.000000e+00> : vector<16xf32>
    %108 = vector.multi_reduction <add>, %107, %cst_36 [1] : vector<16x32xf32> to vector<16xf32>
    %109 = vector.shape_cast %108 : vector<16xf32> to vector<16x1xf32>
    %cst_37 = arith.constant 3.200000e+01 : f32
    %110 = vector.broadcast %cst_37 : f32 to vector<16x1xf32>
    %111 = arith.divf %109, %110 : vector<16x1xf32>
    %112 = vector.broadcast %104 : vector<16x1xf32> to vector<16x32xf32>
    %113 = arith.subf %100, %112 : vector<16x32xf32>
    %cst_38 = arith.constant 9.99999974E-6 : f32
    %114 = vector.broadcast %cst_38 : f32 to vector<16x1xf32>
    %115 = arith.addf %111, %114 : vector<16x1xf32>
    %116 = math.rsqrt %115 : vector<16x1xf32>
    %117 = vector.broadcast %116 : vector<16x1xf32> to vector<16x32xf32>
    %118 = arith.mulf %113, %117 : vector<16x32xf32>
    %119 = vector.broadcast %5 : vector<1x32xf32> to vector<16x32xf32>
    %120 = arith.mulf %118, %119 : vector<16x32xf32>
    %121 = vector.broadcast %6 : vector<1x32xf32> to vector<16x32xf32>
    %122 = arith.addf %120, %121 : vector<16x32xf32>
    %c0_39 = arith.constant 0 : index
    %c0_40 = arith.constant 0 : index
    %123 = vector.load %arg8[%c0_39, %c0_40] : memref<16x32xf32, #tpu.memory_space<vmem>>, vector<16x32xf32>
    tpu.vector_store %arg8[%c0_39, %c0_40], %122 {strides = array<i32>} : memref<16x32xf32, #tpu.memory_space<vmem>>, vector<16x32xf32>,
    return
  }
}

</mosaic_0001>

<bundles_post_ra>
// kernel: encoder_layer.1
= control target key start
LH: loop header
LB: loop body
LE: loop exit
PB: predicated region body
PF: predicated region fallthrough
CT: control target
= control target key end

     0   :  { %vm49_vm0 = vcmask 261120   ;;  %s2523_s0 = inlined_call_operand.vmem [shape: f32[16,32], index: 0, kind: input, shape index: {}]   ;;  %s2524_s1 = inlined_call_operand.vmem [shape: f32[32,96], index: 1, kind: input, shape index: {}]   ;;  %s2525_s2 = inlined_call_operand.vmem [shape: f32[1,96], index: 2, kind: input, shape index: {}]   ;;  %s2526_s3 = inlined_call_operand.vmem [shape: f32[32,32], index: 3, kind: input, shape index: {}]   ;;  %s2527_s4 = inlined_call_operand.vmem [shape: f32[32,64], index: 4, kind: input, shape index: {}]   ;;  %s2528_s5 = inlined_call_operand.vmem [shape: f32[1,64], index: 5, kind: input, shape index: {}]   ;;  %s2529_s6 = inlined_call_operand.vmem [shape: f32[64,32], index: 6, kind: input, shape index: {}]   ;;  %s2530_s7 = inlined_call_operand.vmem [shape: f32[6,32], index: 7, kind: input, shape index: {}]   ;;  %s2531_s8 = inlined_call_operand.hbm [shape: f32[16,32], index: 8, kind: output, shape index: {}]  }
   0x1   :  { %v41_v0 = vld [vmem:[%s2524_s1 + $0x18] sm:$0xff]  ;;  %v40_v1 = vld [vmem:[%s2524_s1 + $0x10] sm:$0xff]  ;;  %v2252_v2 = vld [vmem:[%s2523_s0] sm:$0xff] }
   0x2   :  { %1980 = vmatprep.subr.mxu1 %v41_v0  ;;  %v39_v3 = vld [vmem:[%s2524_s1 + $0x8] sm:$0xff]  ;;  %1988 = vmatprep.mubr.msk.f32.mxu1 %vm49_vm0, %v2252_v2 }
   0x3   :  { %1981 = vmatpush3.msra.mxu1 %v41_v0 }
   0x4   :  { %13 = vsyncpa [#allocation3], 0  ;;  %1982 = vmatprep.subr.mxu1 %v40_v1  ;;  %v38_v4 = vld [vmem:[%s2524_s1] sm:$0xff]  ;;  %v2265_v5 = vld [vmem:[%s2523_s0 + $0x8] sm:$0xff]  ;;  %v2186_v7 = vmov 0.0   ;;  %s2187_s0 = smov 112  }
   0x5   :  { %1983 = vmatpush3.msra.mxu1 %v40_v1  ;;  %2001 = vmatprep.subr.mxu0 %v2186_v7  ;;  %v1880_v8 = vld [vmem:[%s2525_s2] ss:$0 sm:$0xff]  ;;  %s2188_s18 = smov 120   ;;  %vm2189_vm1 = vmmov 0   ;;  %s2190_s2 = smov 104   ;;  %vm161_vm2 = vcmask 64512  }
   0x6   :  { %1984 = vmatprep.subr.mxu1 %v39_v3  ;;  %2003 = vmatprep.mubr.msk.f32.mxu0 %vm2189_vm1, %v2186_v7  ;;  %s2191_s19 = smov 96   ;;  %s2192_s20 = smov 64   ;;  %vm1498_vm3 = vcmask 130048   ;;  %vm1501_vm4 = vcmask 195584   ;;  %vm1740_vm5 = vcmask 523264  }
   0x7   :  { %1985 = vmatpush3.msra.mxu1 %v39_v3  ;;  %s2193_s29 = smov 8   ;;  %s2194_s30 = smov 16  }
   0x8   :  { %1986 = vmatprep.subr.mxu1 %v38_v4 }
   0x9   :  { %1987 = vmatpush3.msra.mxu1 %v38_v4 }
   0xa   :  { %1989 = vmatmul.mubr.msk.f32.vlgmr.msra.gmra.mxu1 %vm49_vm0, %v2265_v5  ;;  %1991 = vmatprep.subr.mxu1 %v2186_v7 }
   0xb   :  { %1993 = vmatprep.mubr.msk.f32.mxu1 %vm2189_vm1, %v2186_v7 }
  0xca   :  { %v1990_v6 = vpop.f32.mrf.mxu1 }
  0xcb   :  { %v2282_v11 = vadd.f32 %v1990_v6, %v1880_v8 }
  0xcc   :  { %v122_v9 = vpop.f32.mrf.mxu1 }
  0xcd   :  { %v2274_v10 = vadd.f32 %v1880_v8, %v122_v9  ;;  %v152_v21 = vmul.f32 0.35355338, %v2282_v11 }
  0xcf   :  { %139 = vrot.lane.b32.xlu1 %v2274_v10, %s2187_s0  ;;  %133 = vrot.lane.b32.xlu0 %v2274_v10, %s2188_s18  ;;  %v151_v19 = vmul.f32 0.35355338, %v2274_v10 }
  0xd3   :  { %141 = vrot.lane.b32.xlu1 %v2282_v11, %s2187_s0  ;;  %135 = vrot.lane.b32.xlu0 %v2282_v11, %s2188_s18  ;;  %s2196_s0 = smov [#allocation2]  }
  0xd4   :  { %s1869_s18 = sshll.u32 %s2196_s0, 4  ;;  %s1870_s18 = int_to_ptr.vmem [resolvable:$true] %s1869_s18 }
  0xd5   :  { %p2169_p1 = scmp.lt.s32.totalorder %s1870_s18, %s1870_s18 }
  0xd7   :  { %147 = vrot.lane.b32.xlu1 %v2282_v11, %s2190_s2  ;;  %145 = vrot.lane.b32.xlu0 %v2274_v10, %s2190_s2  ;;  %s2164_s2 = scalar_lea.vmem %s1870_s18, 256 }
  0xd8   :  { %p2165_p0 = scmp.ne.s32.totalorder %s1870_s18, %s2164_s2  ;;  %p2170_p2 = scmp.lt.s32.totalorder %s2164_s2, %s2164_s2 }
  0xda   :  { %p2171_p3 = por %p2170_p2, %p2169_p1 }
  0xdb   :  { %237 = vrot.lane.b32.xlu1 %v2282_v11, %s2191_s19  ;;  %159 = vrot.lane.b32.xlu0 %v2274_v10, %s2191_s19 }
  0xdc   :  { %p2172_p4 = pnand %p2171_p3, %p2165_p0 }
 0x141   :  { %v2290_v12 = vpop.permute.xlu1 %139  ;;  %v2292_v13 = vpop.permute.xlu0 %133 }
 0x142   :  { %314 = vrot.lane.b32.xlu0 %v2292_v13, %s2191_s19  ;;  %v153_v23 = vmul.f32 0.35355338, %v2292_v13  ;;  %v155_v26 = vmul.f32 0.35355338, %v2290_v12 }
 0x145   :  { %v2295_v14 = vpop.permute.xlu1 %141  ;;  %v2297_v15 = vpop.permute.xlu0 %135 }
 0x146   :  { %468 = vrot.lane.b32.xlu0 %v2290_v12, %s2191_s19  ;;  %391 = vrot.lane.b32.xlu1 %v2297_v15, %s2191_s19  ;;  %v154_v27 = vmul.f32 0.35355338, %v2297_v15  ;;  %v156_v30 = vmul.f32 0.35355338, %v2295_v14 }
 0x149   :  { %v2301_v16 = vpop.permute.xlu0 %145  ;;  %v2305_v17 = vpop.permute.xlu1 %147 }
 0x14a   :  { %545 = vrot.lane.b32.xlu1 %v2295_v14, %s2191_s19  ;;  %622 = vrot.lane.b32.xlu0 %v2301_v16, %s2191_s19  ;;  %v157_v31 = vmul.f32 0.35355338, %v2301_v16  ;;  %v158_v33 = vmul.f32 0.35355338, %v2305_v17 }
 0x14d   :  { %v160_v18 = vpop.permute.xlu0 %159  ;;  %v238_v20 = vpop.permute.xlu1 %237 }
 0x14e   :  { %699 = vrot.lane.b32.xlu1 %v2305_v17, %s2191_s19  ;;  %1992 = vmatpush3.xpose.msk.msra.mxu1 %vm161_vm2, %v160_v18 }
 0x14f   :  { %1996 = vmatprep.subr.mxu1 %v2186_v7 }
 0x151   :  { %1994 = vmatmul.mubr.msk.f32.vlgmr.msra.gmra.mxu1 %vm161_vm2, %v151_v19 }
 0x152   :  { %1997 = vmatpush3.xpose.msk.msra.mxu1 %vm161_vm2, %v238_v20  ;;  %1998 = vmatprep.mubr.msk.f32.mxu1 %vm2189_vm1, %v2186_v7 }
 0x153   :  { %2006 = vmatprep.subr.mxu1 %v2186_v7 }
 0x155   :  { %1999 = vmatmul.mubr.msk.f32.vlgmr.msra.gmra.mxu1 %vm161_vm2, %v152_v21 }
 0x156   :  { %2008 = vmatprep.mubr.msk.f32.mxu1 %vm2189_vm1, %v2186_v7 }
 0x1b4   :  { %v315_v22 = vpop.permute.xlu0 %314 }
 0x1b5   :  { %2002 = vmatpush3.xpose.msk.msra.mxu0 %vm161_vm2, %v315_v22 }
 0x1b6   :  { %2011 = vmatprep.subr.mxu0 %v2186_v7 }
 0x1b8   :  { %v392_v24 = vpop.permute.xlu1 %391  ;;  %2004 = vmatmul.mubr.msk.f32.vlgmr.msra.gmra.mxu0 %vm161_vm2, %v153_v23  ;;  %v469_v25 = vpop.permute.xlu0 %468 }
 0x1b9   :  { %2007 = vmatpush3.xpose.msk.msra.mxu1 %vm161_vm2, %v392_v24  ;;  %2012 = vmatpush3.xpose.msk.msra.mxu0 %vm161_vm2, %v469_v25 }
 0x1ba   :  { %2013 = vmatprep.mubr.msk.f32.mxu0 %vm2189_vm1, %v2186_v7  ;;  %2021 = vmatprep.subr.mxu0 %v2186_v7 }
 0x1bb   :  { %2016 = vmatprep.subr.mxu1 %v2186_v7 }
 0x1bc   :  { %v546_v28 = vpop.permute.xlu1 %545  ;;  %2014 = vmatmul.mubr.msk.f32.vlgmr.msra.gmra.mxu0 %vm161_vm2, %v155_v26  ;;  %v623_v29 = vpop.permute.xlu0 %622  ;;  %2009 = vmatmul.mubr.msk.f32.vlgmr.msra.gmra.mxu1 %vm161_vm2, %v154_v27 }
 0x1bd   :  { %2017 = vmatpush3.xpose.msk.msra.mxu1 %vm161_vm2, %v546_v28  ;;  %2022 = vmatpush3.xpose.msk.msra.mxu0 %vm161_vm2, %v623_v29 }
 0x1be   :  { %2018 = vmatprep.mubr.msk.f32.mxu1 %vm2189_vm1, %v2186_v7  ;;  %2023 = vmatprep.mubr.msk.f32.mxu0 %vm2189_vm1, %v2186_v7 }
 0x1bf   :  { %2026 = vmatprep.subr.mxu1 %v2186_v7  ;;  %2031 = vmatprep.subr.mxu0 %v2186_v7 }
 0x1c0   :  { %v700_v32 = vpop.permute.xlu1 %699  ;;  %2019 = vmatmul.mubr.msk.f32.vlgmr.msra.gmra.mxu1 %vm161_vm2, %v156_v30  ;;  %2024 = vmatmul.mubr.msk.f32.vlgmr.msra.gmra.mxu0 %vm161_vm2, %v157_v31 }
 0x1c1   :  { %2027 = vmatpush3.xpose.msk.msra.mxu1 %vm161_vm2, %v700_v32  ;;  %2028 = vmatprep.mubr.msk.f32.mxu1 %vm2189_vm1, %v2186_v7 }
 0x1c2   :  { %2036 = vmatprep.subr.mxu1 %v2186_v7  ;;  %2033 = vmatprep.mubr.msk.f32.mxu0 %vm2189_vm1, %v2186_v7 }
 0x1c4   :  { %2029 = vmatmul.mubr.msk.f32.vlgmr.msra.gmra.mxu1 %vm161_vm2, %v158_v33 }
 0x1c5   :  { %2038 = vmatprep.mubr.msk.f32.mxu1 %vm2189_vm1, %v2186_v7 }
 0x211   :  { %v233_v34 = vpop.f32.mrf.mxu1 }
 0x212   :  { %v776_v35 = vsel %vm161_vm2, %v233_v34, -inf }
 0x213   :  { %777 = vmax.xlane.f32.xlu0 %v776_v35  ;;  %v1995_v36 = vpop.f32.mrf.mxu1 }
 0x215   :  { %v310_v37 = vpop.f32.mrf.mxu1 }
 0x216   :  { %v779_v38 = vsel %vm161_vm2, %v310_v37, -inf }
 0x217   :  { %780 = vmax.xlane.f32.xlu1 %v779_v38  ;;  %v2000_v39 = vpop.f32.mrf.mxu1 }
 0x278   :  { %v387_v40 = vpop.f32.mrf.mxu0 }
 0x279   :  { %v782_v41 = vsel %vm161_vm2, %v387_v40, -inf }
 0x27a   :  { %v2005_v42 = vpop.f32.mrf.mxu0  ;;  %783 = vmax.xlane.f32.xlu0 %v782_v41 }
 0x27c   :  { %v464_v43 = vpop.f32.mrf.mxu1  ;;  %v541_v44 = vpop.f32.mrf.mxu0 }
 0x27d   :  { %v788_v45 = vsel %vm161_vm2, %v541_v44, -inf  ;;  %v785_v46 = vsel %vm161_vm2, %v464_v43, -inf }
 0x27e   :  { %v2015_v47 = vpop.f32.mrf.mxu0  ;;  %789 = vmax.xlane.f32.xlu1 %v788_v45  ;;  %786 = vmax.xlane.f32.xlu0 %v785_v46  ;;  %v2010_v48 = vpop.f32.mrf.mxu1 }
 0x280   :  { %v618_v49 = vpop.f32.mrf.mxu1  ;;  %v695_v50 = vpop.f32.mrf.mxu0 }
 0x281   :  { %v794_v51 = vsel %vm161_vm2, %v695_v50, -inf  ;;  %v791_v52 = vsel %vm161_vm2, %v618_v49, -inf }
 0x282   :  { %v2025_v53 = vpop.f32.mrf.mxu0  ;;  %795 = vmax.xlane.f32.xlu1 %v794_v51  ;;  %792 = vmax.xlane.f32.xlu0 %v791_v52  ;;  %v2020_v54 = vpop.f32.mrf.mxu1 }
 0x284   :  { %v772_v55 = vpop.f32.mrf.mxu1 }
 0x285   :  { %v797_v56 = vsel %vm161_vm2, %v772_v55, -inf }
 0x286   :  { %798 = vmax.xlane.f32.xlu0 %v797_v56  ;;  %v2030_v57 = vpop.f32.mrf.mxu1 }
 0x293   :  { %864 = vrot.lane.b32.xlu1 %v2274_v10, %s2192_s20 }
 0x297   :  { %1016 = vrot.lane.b32.xlu1 %v2292_v13, %s2192_s20 }
 0x29b   :  { %1092 = vrot.lane.b32.xlu1 %v2297_v15, %s2192_s20 }
 0x29c   :  { %940 = vrot.lane.b32.xlu0 %v2282_v11, %s2192_s20  ;;  %v778_v60 = vpop.xlane.xlu0 %777 }
 0x29d   :  { %v800_v61 = vsub.f32 %v233_v34, %v778_v60 }
 0x29f   :  { %1244 = vrot.lane.b32.xlu1 %v2295_v14, %s2192_s20  ;;  %v808_v63 = vmul.f32 1.442695, %v800_v61 }
 0x2a0   :  { %1168 = vrot.lane.b32.xlu0 %v2290_v12, %s2192_s20  ;;  %v781_v58 = vpop.xlane.xlu1 %780 }
 0x2a1   :  { %v801_v59 = vsub.f32 %v310_v37, %v781_v58 }
 0x2a3   :  { %v810_v62 = vmul.f32 1.442695, %v801_v59 }
 0x2a5   :  { %2124 = vpow2.f32 %v810_v62 }
 0x2a6   :  { %2126 = vpow2.f32 %v808_v63 }
 0x2b2   :  { %v2376_v0 = vpop.eup %2124 }
 0x2b3   :  { %v827_v1 = vsel %vm161_vm2, %v2376_v0, 0.0  ;;  %v2380_v3 = vpop.eup %2126 }
 0x2b4   :  { %v824_v4 = vsel %vm161_vm2, %v2380_v3, 0.0 }
 0x2bf   :  { %828 = vadd.xlane.f32.xlu0 %v827_v1 }
 0x2c3   :  { %825 = vadd.xlane.f32.xlu1 %v824_v4 }
 0x303   :  { %v784_v6 = vpop.xlane.xlu0 %783 }
 0x304   :  { %v802_v8 = vsub.f32 %v387_v40, %v784_v6 }
 0x306   :  { %v812_v9 = vmul.f32 1.442695, %v802_v8 }
 0x307   :  { %v790_v10 = vpop.xlane.xlu1 %789  ;;  %v787_v11 = vpop.xlane.xlu0 %786 }
 0x308   :  { %2128 = vpow2.f32 %v812_v9  ;;  %v804_v12 = vsub.f32 %v541_v44, %v790_v10  ;;  %v803_v13 = vsub.f32 %v464_v43, %v787_v11 }
 0x30a   :  { %v816_v14 = vmul.f32 1.442695, %v804_v12  ;;  %v814_v15 = vmul.f32 1.442695, %v803_v13  ;;  %v1507_v12 = vld [vmem:[%s2526_s3 + $0x18] sm:$0xff]  ;;  %v1506_v13 = vld [vmem:[%s2526_s3 + $0x10] sm:$0xff] }
 0x30b   :  { %v796_v18 = vpop.xlane.xlu1 %795  ;;  %v793_v19 = vpop.xlane.xlu0 %792 }
 0x30c   :  { %2130 = vpow2.f32 %v816_v14  ;;  %v806_v20 = vsub.f32 %v695_v50, %v796_v18  ;;  %v805_v21 = vsub.f32 %v618_v49, %v793_v19  ;;  %v1504_v14 = vld [vmem:[%s2526_s3] sm:$0xff] }
 0x30d   :  { %2132 = vpow2.f32 %v814_v15 }
 0x30e   :  { %v820_v22 = vmul.f32 1.442695, %v806_v20  ;;  %v818_v23 = vmul.f32 1.442695, %v805_v21 }
 0x30f   :  { %v865_v24 = vpop.permute.xlu1 %864  ;;  %v799_v25 = vpop.xlane.xlu0 %798 }
 0x310   :  { %2134 = vpow2.f32 %v820_v22  ;;  %v807_v26 = vsub.f32 %v772_v55, %v799_v25  ;;  %2032 = vmatpush3.msra.mxu0 %v865_v24 }
 0x311   :  { %2136 = vpow2.f32 %v818_v23  ;;  %2041 = vmatprep.subr.mxu0 %v2186_v7 }
 0x312   :  { %v822_v27 = vmul.f32 1.442695, %v807_v26 }
 0x313   :  { %v941_v28 = vpop.permute.xlu0 %940  ;;  %v1017_v41 = vpop.permute.xlu1 %1016 }
 0x314   :  { %2138 = vpow2.f32 %v822_v27  ;;  %2037 = vmatpush3.msra.mxu1 %v941_v28 }
 0x315   :  { %v2129_v29 = vpop.eup %2128  ;;  %2046 = vmatprep.subr.mxu1 %v2186_v7 }
 0x316   :  { %v830_v30 = vsel %vm161_vm2, %v2129_v29, 0.0 }
 0x317   :  { %831 = vadd.xlane.f32.xlu1 %v830_v30  ;;  %v1093_v42 = vpop.permute.xlu1 %1092  ;;  %v1169_v43 = vpop.permute.xlu0 %1168 }
 0x319   :  { %v2131_v31 = vpop.eup %2130 }
 0x31a   :  { %v2133_v32 = vpop.eup %2132  ;;  %v836_v33 = vsel %vm161_vm2, %v2131_v31, 0.0 }
 0x31b   :  { %837 = vadd.xlane.f32.xlu1 %v836_v33  ;;  %v833_v34 = vsel %vm161_vm2, %v2133_v32, 0.0  ;;  %v1245_v44 = vpop.permute.xlu1 %1244 }
 0x31c   :  { %834 = vadd.xlane.f32.xlu0 %v833_v34 }
 0x31d   :  { %v2135_v35 = vpop.eup %2134 }
 0x31e   :  { %v2389_v36 = vpop.eup %2136  ;;  %v842_v37 = vsel %vm161_vm2, %v2135_v35, 0.0 }
 0x31f   :  { %843 = vadd.xlane.f32.xlu1 %v842_v37  ;;  %v839_v38 = vsel %vm161_vm2, %v2389_v36, 0.0 }
 0x320   :  { %840 = vadd.xlane.f32.xlu0 %v839_v38 }
 0x321   :  { %v2394_v39 = vpop.eup %2138 }
 0x322   :  { %v845_v40 = vsel %vm161_vm2, %v2394_v39, 0.0 }
 0x324   :  { %846 = vadd.xlane.f32.xlu0 %v845_v40 }
 0x330   :  { %1396 = vrot.lane.b32.xlu1 %v2305_v17, %s2192_s20 }
 0x33a   :  { %1320 = vrot.lane.b32.xlu0 %v2301_v16, %s2192_s20 }
 0x348   :  { %v829_v45 = vpop.xlane.xlu0 %828 }
 0x349   :  { %2140 = vrcp.f32 %v829_v45 }
 0x34c   :  { %v826_v46 = vpop.xlane.xlu1 %825 }
 0x34d   :  { %2142 = vrcp.f32 %v826_v46 }
 0x356   :  { %v2141_v47 = vpop.eup %2140 }
 0x357   :  { %v857_v48 = vmul.f32 %v2141_v47, %v2376_v0 }
 0x359   :  { %2039 = vmatmul.mubr.msk.f32.vlgmr.msra.gmra.mxu1 %vm161_vm2, %v857_v48 }
 0x35a   :  { %v2143_v49 = vpop.eup %2142  ;;  %2047 = vmatpush3.msra.mxu1 %v1093_v42  ;;  %2048 = vmatprep.mubr.msk.f32.mxu1 %vm2189_vm1, %v2186_v7 }
 0x35b   :  { %v856_v16 = vmul.f32 %v2143_v49, %v2380_v3  ;;  %2056 = vmatprep.subr.mxu1 %v2186_v7 }
 0x35d   :  { %2034 = vmatmul.mubr.msk.f32.vlgmr.msra.gmra.mxu0 %vm161_vm2, %v856_v16 }
 0x35e   :  { %2042 = vmatpush3.msra.mxu0 %v1017_v41  ;;  %2043 = vmatprep.mubr.msk.f32.mxu0 %vm2189_vm1, %v2186_v7  ;;  %v1907_v41 = vld [vmem:[%s2530_s7] ss:$0 sm:$0xff] }
 0x35f   :  { %2051 = vmatprep.subr.mxu0 %v2186_v7 }
 0x3a0   :  { %v832_v17 = vpop.xlane.xlu1 %831 }
 0x3a1   :  { %2144 = vrcp.f32 %v832_v17 }
 0x3a4   :  { %v838_v50 = vpop.xlane.xlu1 %837 }
 0x3a5   :  { %2146 = vrcp.f32 %v838_v50  ;;  %v835_v51 = vpop.xlane.xlu0 %834 }
 0x3a6   :  { %2148 = vrcp.f32 %v835_v51 }
 0x3a8   :  { %v844_v52 = vpop.xlane.xlu1 %843 }
 0x3a9   :  { %2150 = vrcp.f32 %v844_v52  ;;  %v841_v53 = vpop.xlane.xlu0 %840 }
 0x3aa   :  { %2152 = vrcp.f32 %v841_v53 }
 0x3ac   :  { %v1397_v3 = vpop.permute.xlu1 %1396 }
 0x3ad   :  { %v847_v54 = vpop.xlane.xlu0 %846 }
 0x3ae   :  { %v2145_v55 = vpop.eup %2144  ;;  %2154 = vrcp.f32 %v847_v54 }
 0x3af   :  { %v858_v56 = vmul.f32 %v2145_v55, %v2129_v29 }
 0x3b1   :  { %2044 = vmatmul.mubr.msk.f32.vlgmr.msra.gmra.mxu0 %vm161_vm2, %v858_v56  ;;  %v1321_v61 = vpop.permute.xlu0 %1320 }
 0x3b2   :  { %v2147_v57 = vpop.eup %2146  ;;  %2052 = vmatpush3.msra.mxu0 %v1169_v43  ;;  %2053 = vmatprep.mubr.msk.f32.mxu0 %vm2189_vm1, %v2186_v7 }
 0x3b3   :  { %v2149_v58 = vpop.eup %2148  ;;  %2061 = vmatprep.subr.mxu0 %v2186_v7  ;;  %v860_v59 = vmul.f32 %v2147_v57, %v2131_v31  ;;  %v1636_v57 = vld [vmem:[%s2527_s4 + $0x10] sm:$0xff] }
 0x3b4   :  { %v859_v60 = vmul.f32 %v2149_v58, %v2133_v32  ;;  %v1635_v58 = vld [vmem:[%s2527_s4 + $0x8] sm:$0xff] }
 0x3b5   :  { %2054 = vmatmul.mubr.msk.f32.vlgmr.msra.gmra.mxu0 %vm161_vm2, %v860_v59  ;;  %v1634_v59 = vld [vmem:[%s2527_s4] sm:$0xff] }
 0x3b6   :  { %v2151_v62 = vpop.eup %2150  ;;  %2049 = vmatmul.mubr.msk.f32.vlgmr.msra.gmra.mxu1 %vm161_vm2, %v859_v60  ;;  %2062 = vmatpush3.msra.mxu0 %v1321_v61  ;;  %v1735_v60 = vld [vmem:[%s2529_s6 + $0x38] sm:$0xff]  ;;  %v1734_v61 = vld [vmem:[%s2529_s6 + $0x30] sm:$0xff] }
 0x3b7   :  { %v2153_v63 = vpop.eup %2152  ;;  %2057 = vmatpush3.msra.mxu1 %v1245_v44  ;;  %2058 = vmatprep.mubr.msk.f32.mxu1 %vm2189_vm1, %v2186_v7  ;;  %v862_v0 = vmul.f32 %v2151_v62, %v2135_v35  ;;  %v1733_v62 = vld [vmem:[%s2529_s6 + $0x28] sm:$0xff] }
 0x3b8   :  { %2063 = vmatprep.mubr.msk.f32.mxu0 %vm2189_vm1, %v2186_v7  ;;  %2066 = vmatprep.subr.mxu1 %v2186_v7  ;;  %v861_v1 = vmul.f32 %v2153_v63, %v2389_v36  ;;  %v1732_v63 = vld [vmem:[%s2529_s6 + $0x20] sm:$0xff] }
 0x3b9   :  { %2064 = vmatmul.mubr.msk.f32.vlgmr.msra.gmra.mxu0 %vm161_vm2, %v862_v0  ;;  %2071 = vmatprep.subr.mxu0 %v1507_v12 }
 0x3ba   :  { %2059 = vmatmul.mubr.msk.f32.vlgmr.msra.gmra.mxu1 %vm161_vm2, %v861_v1  ;;  %2072 = vmatpush3.msra.mxu0 %v1507_v12  ;;  %v1911_v12 = vld [vmem:[%s2530_s7 + $0x2] ss:$0 sm:$0xff] }
 0x3bb   :  { %v2155_v4 = vpop.eup %2154  ;;  %2067 = vmatpush3.msra.mxu1 %v1397_v3  ;;  %2068 = vmatprep.mubr.msk.f32.mxu1 %vm2189_vm1, %v2186_v7  ;;  %v1505_v7 = vld [vmem:[%s2526_s3 + $0x8] sm:$0xff]  ;;  %s2195_s3 = smov 24  }
 0x3bc   :  { %v863_v6 = vmul.f32 %v2155_v4, %v2394_v39  ;;  %2073 = vmatprep.subr.mxu0 %v1506_v13 }
 0x3bd   :  { %2074 = vmatpush3.msra.mxu0 %v1506_v13 }
 0x3be   :  { %2069 = vmatmul.mubr.msk.f32.vlgmr.msra.gmra.mxu1 %vm161_vm2, %v863_v6  ;;  %2075 = vmatprep.subr.mxu0 %v1505_v7 }
 0x3bf   :  { %2076 = vmatpush3.msra.mxu0 %v1505_v7 }
 0x3c0   :  { %2077 = vmatprep.subr.mxu0 %v1504_v14 }
 0x3c1   :  { %2078 = vmatpush3.msra.mxu0 %v1504_v14 }
 0x3c2   :  { %2093 = vmatprep.subr.mxu0 %v1735_v60 }
 0x419   :  { %v1012_v8 = vpop.f32.mrf.mxu1 }
 0x41b   :  { %v2040_v9 = vpop.f32.mrf.mxu1 }
 0x41d   :  { %v936_v10 = vpop.f32.mrf.mxu0 }
 0x41f   :  { %v2035_v11 = vpop.f32.mrf.mxu0 }
 0x471   :  { %v1088_v15 = vpop.f32.mrf.mxu0 }
 0x472   :  { %1474 = vrot.lane.b32.xlu0 %v1088_v15, %s2193_s29 }
 0x473   :  { %v2045_v18 = vpop.f32.mrf.mxu0 }
 0x475   :  { %v1240_v19 = vpop.f32.mrf.mxu0 }
 0x476   :  { %v1164_v20 = vpop.f32.mrf.mxu1  ;;  %1482 = vrot.lane.b32.xlu0 %v1240_v19, %s2194_s30 }
 0x477   :  { %1476 = vrot.lane.b32.xlu1 %v1164_v20, %s2193_s29  ;;  %v2055_v21 = vpop.f32.mrf.mxu0  ;;  %v1731_v20 = vld [vmem:[%s2529_s6 + $0x18] sm:$0xff] }
 0x478   :  { %v2050_v22 = vpop.f32.mrf.mxu1  ;;  %v1730_v21 = vld [vmem:[%s2529_s6 + $0x10] sm:$0xff] }
 0x479   :  { %v1392_v23 = vpop.f32.mrf.mxu0  ;;  %v1729_v22 = vld [vmem:[%s2529_s6 + $0x8] sm:$0xff] }
 0x47a   :  { %v1316_v24 = vpop.f32.mrf.mxu1  ;;  %1490 = vrot.lane.b32.xlu0 %v1392_v23, %s2195_s3  ;;  %v1728_v23 = vld [vmem:[%s2529_s6] sm:$0xff] }
 0x47b   :  { %1484 = vrot.lane.b32.xlu1 %v1316_v24, %s2194_s30  ;;  %v2065_v25 = vpop.f32.mrf.mxu0  ;;  %v1912_v24 = vld [vmem:[%s2528_s5] ss:$0 sm:$0xff] }
 0x47c   :  { %v2060_v26 = vpop.f32.mrf.mxu1 }
 0x47e   :  { %v1468_v27 = vpop.f32.mrf.mxu1 }
 0x47f   :  { %1492 = vrot.lane.b32.xlu1 %v1468_v27, %s2195_s3 }
 0x480   :  { %v2070_v28 = vpop.f32.mrf.mxu1 }
 0x4e4   :  { %v1475_v29 = vpop.permute.xlu0 %1474 }
 0x4e5   :  { %v1496_v32 = vsel %vm161_vm2, %v936_v10, %v1475_v29  ;;  %v1910_v10 = vld [vmem:[%s2530_s7 + $0x1] ss:$0 sm:$0xff] }
 0x4e8   :  { %v1483_v30 = vpop.permute.xlu0 %1482 }
 0x4e9   :  { %v1477_v31 = vpop.permute.xlu1 %1476  ;;  %v1499_v33 = vsel %vm1498_vm3, %v1496_v32, %v1483_v30 }
 0x4ea   :  { %v1497_v37 = vsel %vm161_vm2, %v1012_v8, %v1477_v31  ;;  %v1915_v31 = vld [vmem:[%s2530_s7 + $0x3] ss:$0 sm:$0xff] }
 0x4ec   :  { %v1491_v34 = vpop.permute.xlu0 %1490 }
 0x4ed   :  { %v1502_v35 = vsel %vm1501_vm4, %v1499_v33, %v1491_v34  ;;  %v1485_v36 = vpop.permute.xlu1 %1484 }
 0x4ee   :  { %2079 = vmatprep.mubr.msk.f32.mxu0 %vm49_vm0, %v1502_v35  ;;  %v1500_v38 = vsel %vm1498_vm3, %v1497_v37, %v1485_v36 }
 0x4f1   :  { %v1493_v39 = vpop.permute.xlu1 %1492 }
 0x4f2   :  { %v1503_v40 = vsel %vm1501_vm4, %v1500_v38, %v1493_v39 }
 0x4f3   :  { %2080 = vmatmul.mubr.msk.f32.vlgmr.msra.gmra.mxu0 %vm49_vm0, %v1503_v40 }
 0x4f4   :  { %2094 = vmatpush3.msra.mxu0 %v1735_v60 }
 0x4f5   :  { %2095 = vmatprep.subr.mxu0 %v1734_v61 }
 0x4f6   :  { %2096 = vmatpush3.msra.mxu0 %v1734_v61 }
 0x4f7   :  { %2097 = vmatprep.subr.mxu0 %v1733_v62 }
 0x4f8   :  { %2098 = vmatpush3.msra.mxu0 %v1733_v62 }
 0x4f9   :  { %2099 = vmatprep.subr.mxu0 %v1732_v63 }
 0x4fa   :  { %2100 = vmatpush3.msra.mxu0 %v1732_v63 }
 0x4fb   :  { %2101 = vmatprep.subr.mxu0 %v1731_v20 }
 0x4fc   :  { %2102 = vmatpush3.msra.mxu0 %v1731_v20 }
 0x4fd   :  { %2103 = vmatprep.subr.mxu0 %v1730_v21 }
 0x4fe   :  { %2104 = vmatpush3.msra.mxu0 %v1730_v21 }
 0x4ff   :  { %2105 = vmatprep.subr.mxu0 %v1729_v22 }
 0x500   :  { %2106 = vmatpush3.msra.mxu0 %v1729_v22 }
 0x501   :  { %2107 = vmatprep.subr.mxu0 %v1728_v23 }
 0x502   :  { %2108 = vmatpush3.msra.mxu0 %v1728_v23 }
 0x5b3   :  { %v2081_v42 = vpop.f32.mrf.mxu0 }
 0x5b4   :  { %v1590_v43 = vadd.f32 %v2081_v42, %v1907_v41 }
 0x5b5   :  { %v1584_v44 = vpop.f32.mrf.mxu0 }
 0x5b6   :  { %v1585_v45 = vadd.f32 %v1907_v41, %v1584_v44  ;;  %v1594_v46 = vadd.f32 %v1590_v43, %v2265_v5 }
 0x5b8   :  { %v1598_v47 = vsel %vm49_vm0, %v1594_v46, 0.0  ;;  %v1593_v48 = vadd.f32 %v1585_v45, %v2252_v2  ;;  %v1637_v2 = vld [vmem:[%s2527_s4 + $0x18] sm:$0xff] }
 0x5b9   :  { %1599 = vadd.xlane.f32.xlu1 %v1598_v47  ;;  %2082 = vmatprep.subr.mxu1 %v1637_v2 }
 0x5ba   :  { %v1595_v49 = vsel %vm49_vm0, %v1593_v48, 0.0  ;;  %2083 = vmatpush3.msra.mxu1 %v1637_v2  ;;  %v1919_v2 = vld [vmem:[%s2530_s7 + $0x5] ss:$0 sm:$0xff] }
 0x5bb   :  { %1596 = vadd.xlane.f32.xlu0 %v1595_v49  ;;  %2084 = vmatprep.subr.mxu1 %v1636_v57 }
 0x5bc   :  { %2085 = vmatpush3.msra.mxu1 %v1636_v57 }
 0x5bd   :  { %2086 = vmatprep.subr.mxu1 %v1635_v58 }
 0x5be   :  { %2087 = vmatpush3.msra.mxu1 %v1635_v58 }
 0x5bf   :  { %2088 = vmatprep.subr.mxu1 %v1634_v59 }
 0x5c0   :  { %2089 = vmatpush3.msra.mxu1 %v1634_v59 }
 0x642   :  { %v1600_v16 = vpop.xlane.xlu1 %1599 }
 0x643   :  { %v1603_v17 = vmul.f32 0.03125, %v1600_v16 }
 0x644   :  { %v1597_v50 = vpop.xlane.xlu0 %1596 }
 0x645   :  { %v1602_v51 = vmul.f32 0.03125, %v1597_v50  ;;  %v1605_v52 = vsub.f32 %v1594_v46, %v1603_v17 }
 0x647   :  { %v1604_v53 = vsub.f32 %v1593_v48, %v1602_v51  ;;  %v1607_v56 = vmul.f32 %v1605_v52, %v1605_v52 }
 0x649   :  { %v1606_v54 = vmul.f32 %v1604_v53, %v1604_v53  ;;  %v1611_v5 = vsel %vm49_vm0, %v1607_v56, 0.0 }
 0x64b   :  { %v1608_v55 = vsel %vm49_vm0, %v1606_v54, 0.0 }
 0x64c   :  { %1609 = vadd.xlane.f32.xlu0 %v1608_v55  ;;  %v1918_v55 = vld [vmem:[%s2530_s7 + $0x4] ss:$0 sm:$0xff] }
 0x650   :  { %1612 = vadd.xlane.f32.xlu0 %v1611_v5 }
 0x6d5   :  { %v1610_v0 = vpop.xlane.xlu0 %1609 }
 0x6d6   :  { %v1614_v1 = vmul.f32 0.03125, %v1610_v0 }
 0x6d8   :  { %v1616_v3 = vadd.f32 1e-05, %v1614_v1 }
 0x6d9   :  { %v1613_v4 = vpop.xlane.xlu0 %1612 }
 0x6da   :  { %2156 = vrsqrt.f32 %v1616_v3  ;;  %v1615_v6 = vmul.f32 0.03125, %v1613_v4 }
 0x6dc   :  { %v1617_v8 = vadd.f32 1e-05, %v1615_v6 }
 0x6de   :  { %2158 = vrsqrt.f32 %v1617_v8 }
 0x6e7   :  { %v2157_v9 = vpop.eup %2156 }
 0x6e8   :  { %v1620_v11 = vmul.f32 %v2157_v9, %v1604_v53 }
 0x6ea   :  { %v1626_v13 = vmul.f32 %v1910_v10, %v1620_v11 }
 0x6eb   :  { %v2159_v7 = vpop.eup %2158 }
 0x6ec   :  { %v1621_v14 = vmul.f32 %v2159_v7, %v1605_v52  ;;  %v1632_v15 = vadd.f32 %v1911_v12, %v1626_v13 }
 0x6ee   :  { %v1627_v18 = vmul.f32 %v1910_v10, %v1621_v14  ;;  %2090 = vmatprep.mubr.msk.f32.mxu1 %vm49_vm0, %v1632_v15 }
 0x6f0   :  { %v1633_v19 = vadd.f32 %v1911_v12, %v1627_v18 }
 0x6f2   :  { %2091 = vmatmul.mubr.msk.f32.vlgmr.msra.gmra.mxu1 %vm49_vm0, %v1633_v19 }
 0x7b2   :  { %v2092_v25 = vpop.f32.mrf.mxu1 }
 0x7b3   :  { %v1723_v26 = vadd.f32 %v2092_v25, %v1912_v24 }
 0x7b4   :  { %v1717_v27 = vpop.f32.mrf.mxu1 }
 0x7b5   :  { %v1718_v28 = vadd.f32 %v1912_v24, %v1717_v27  ;;  %v1727_v30 = vmax.f32 %v1723_v26, 0.0 }
 0x7b7   :  { %v1726_v29 = vmax.f32 %v1718_v28, 0.0 }
 0x7b9   :  { %2109 = vmatprep.mubr.msk.f32.mxu0 %vm1740_vm5, %v1726_v29 }
 0x7ba   :  { %2110 = vmatmul.mubr.msk.f32.vlgmr.msra.gmra.mxu0 %vm1740_vm5, %v1727_v30 }
 0x87a   :  { %v2111_v32 = vpop.f32.mrf.mxu0 }
 0x87b   :  { %v1819_v33 = vadd.f32 %v2111_v32, %v1915_v31 }
 0x87c   :  { %v1813_v34 = vpop.f32.mrf.mxu0 }
 0x87d   :  { %v1814_v35 = vadd.f32 %v1915_v31, %v1813_v34  ;;  %v1823_v36 = vadd.f32 %v1819_v33, %v1633_v19 }
 0x87f   :  { %v1827_v37 = vsel %vm49_vm0, %v1823_v36, 0.0  ;;  %v1822_v38 = vadd.f32 %v1814_v35, %v1632_v15 }
 0x880   :  { %1828 = vadd.xlane.f32.xlu0 %v1827_v37 }
 0x881   :  { %v1824_v39 = vsel %vm49_vm0, %v1822_v38, 0.0 }
 0x882   :  { %1825 = vadd.xlane.f32.xlu1 %v1824_v39 }
 0x909   :  { %v1829_v40 = vpop.xlane.xlu0 %1828 }
 0x90a   :  { %v1831_v41 = vmul.f32 0.03125, %v1829_v40 }
 0x90b   :  { %v1826_v42 = vpop.xlane.xlu1 %1825 }
 0x90c   :  { %v1833_v43 = vsub.f32 %v1823_v36, %v1831_v41  ;;  %v1830_v44 = vmul.f32 0.03125, %v1826_v42 }
 0x90e   :  { %v1832_v45 = vsub.f32 %v1822_v38, %v1830_v44  ;;  %v1835_v46 = vmul.f32 %v1833_v43, %v1833_v43 }
 0x910   :  { %v1839_v47 = vsel %vm49_vm0, %v1835_v46, 0.0  ;;  %v1834_v48 = vmul.f32 %v1832_v45, %v1832_v45 }
 0x911   :  { %1840 = vadd.xlane.f32.xlu0 %v1839_v47 }
 0x912   :  { %v1836_v49 = vsel %vm49_vm0, %v1834_v48, 0.0 }
 0x913   :  { %1837 = vadd.xlane.f32.xlu1 %v1836_v49 }
 0x99a   :  { %v1841_v16 = vpop.xlane.xlu0 %1840 }
 0x99b   :  { %v1843_v17 = vmul.f32 0.03125, %v1841_v16 }
 0x99c   :  { %v1838_v50 = vpop.xlane.xlu1 %1837 }
 0x99d   :  { %v1845_v51 = vadd.f32 1e-05, %v1843_v17  ;;  %v1842_v52 = vmul.f32 0.03125, %v1838_v50 }
 0x99f   :  { %2160 = vrsqrt.f32 %v1845_v51  ;;  %v1844_v53 = vadd.f32 1e-05, %v1842_v52 }
 0x9a1   :  { %2162 = vrsqrt.f32 %v1844_v53 }
 0x9ac   :  { %v2161_v54 = vpop.eup %2160 }
 0x9ad   :  { %v1849_v56 = vmul.f32 %v2161_v54, %v1833_v43 }
 0x9ae   :  { %v2163_v5 = vpop.eup %2162 }
 0x9af   :  { %v1848_v57 = vmul.f32 %v2163_v5, %v1832_v45  ;;  %v1855_v58 = vmul.f32 %v1918_v55, %v1849_v56 }
 0x9b1   :  { %v1854_v59 = vmul.f32 %v1918_v55, %v1848_v57  ;;  %v1861_v60 = vadd.f32 %v1919_v2, %v1855_v58 }
 0x9b3   :  { %v1860_v61 = vadd.f32 %v1919_v2, %v1854_v59  ;;  %1863 = vst.msk [vmem:[#allocation2 + $0x8] sm:$0xff] %vm49_vm0, %v1861_v60 }
 0x9b5   :  { %1862 = vst.msk [vmem:[#allocation2] sm:$0xff] %vm49_vm0, %v1860_v61 }
 0x9b6   :  { %2175 = shalt.err (!%p2172_p4)
}
 0x9b7   :  { %s2197_s7 = smov 128  }
 0x9b8   :  { %1875 = dma.vmem_to_hbm [thread:$0]  %s1870_s18, 256, %s2531_s8, [#allocation3], %s2197_s7, %s2197_s7, %s2193_s29  }
 0x9b9   :  { %2184 = dma.done.wait [#allocation3], 256  }
 0x9ba   :  { %2185 = vsyncadd [#allocation3], 4294967040 }
 0x9bb   :  { %1879 = vsyncpa [#allocation3], 1 }

</bundles_post_ra>
